<compile_context>
chip_gen: v7x
topology: tpu7x:2x2x1
jax: 0.10.0
libtpu: 0.0.40
codegen_flags: <defaults>
</compile_context>

<pallas_src>
import jax
import jax.numpy as jnp
from jax.experimental import pallas as pl
from jax.experimental.pallas import tpu as pltpu

# ---- model hyper-parameters (small, consistent with the module) ----
BATCH = 2
INPUT_FEATURES = 4
CLINICAL_FEATURES = 4
TOTAL_FEATURES = INPUT_FEATURES + CLINICAL_FEATURES
HIDDEN = 32
HIDDEN_HALF = HIDDEN // 2
NUM_RES_BLOCKS = 3
BN_EPS = 1e-5

NUM_W_SLOTS = 2 * NUM_RES_BLOCKS + 1        # 7: res-block linears + final lin1
NUM_B_COLS = 2 * NUM_RES_BLOCKS + 4         # 10: 8 biases, wf2 column, bf2


# --------------------------------------------------------------------------
# Kernel  (batch on the lane axis)
# --------------------------------------------------------------------------
def ilop_decoder_kernel(xt_ref, w_in_ref, w_ref, b_ref, out_ref):
    """Fused ILOPDecoder forward for one batch tile.

    xt_ref   : (TOTAL_FEATURES, bb)       f32   transposed [x | clinical] tile
    w_in_ref : (HIDDEN, TOTAL_FEATURES)   bf16  input-layer weight^T, BN folded
    w_ref    : (7, HIDDEN, HIDDEN)        bf16  slots 2i/2i+1 = res block i
                                                linears^T (BN folded); slot 6 =
                                                final linear1^T zero-padded
    b_ref    : (HIDDEN, 10)               f32   cols 0..7 folded biases,
                                                col 8 = final linear2 weight
                                                (zero-padded), col 9 = its bias
    out_ref  : (1, bb)                    f32
    """
    f32, bf16 = jnp.float32, jnp.bfloat16

    # ---- input_layer: single (H,8)@(8,bb) dot, bias add, ReLU ----
    xt = xt_ref[...].astype(bf16)
    h = jnp.dot(w_in_ref[...], xt, preferred_element_type=f32) + b_ref[:, 0:1]
    h = jnp.maximum(h, 0.0)                      # ReLU; Dropout = identity (eval)

    # ---- residual blocks (statically unrolled), bf16 MXU / f32 accumulate ----
    for i in range(NUM_RES_BLOCKS):
        y = (jnp.dot(w_ref[2 * i], h.astype(bf16), preferred_element_type=f32)
             + b_ref[:, 1 + 2 * i:2 + 2 * i])
        y = jnp.maximum(y, 0.0)                  # ReLU (Dropout = identity)
        y = (jnp.dot(w_ref[2 * i + 1], y.astype(bf16), preferred_element_type=f32)
             + b_ref[:, 2 + 2 * i:3 + 2 * i])
        h = jnp.maximum(y + h, 0.0)              # residual add + ReLU

    # ---- final_layer linear1 + ReLU (rows HIDDEN_HALF.. are zero-padded) ----
    z = (jnp.dot(w_ref[2 * NUM_RES_BLOCKS], h.astype(bf16),
                 preferred_element_type=f32)
         + b_ref[:, 1 + 2 * NUM_RES_BLOCKS:2 + 2 * NUM_RES_BLOCKS])
    z = jnp.maximum(z, 0.0)

    # ---- final_layer linear2 (HIDDEN/2 -> 1): VPU mul + sublane reduction ----
    out = jnp.sum(z * b_ref[:, 8:9], axis=0, keepdims=True) + b_ref[0:1, 9:10]
    out_ref[...] = out.astype(out_ref.dtype)


# --------------------------------------------------------------------------
# Wrapper
# --------------------------------------------------------------------------
def _round_up(n, m):
    return ((n + m - 1) // m) * m


def ilop_decoder_forward(x, clinical, w_in_t, wstack, bstack, *,
                         max_batch_block=1024):
    B = x.shape[0]
    # Wrapper-side layout plumbing: present a lane-dense (TOTAL_FEATURES, B) slab.
    xt = jnp.concatenate([x, clinical], axis=1).T.astype(jnp.float32)

    if B <= max_batch_block:
        bb = B
        b_pad = B
    else:
        # Balance the grid across tiles (and across the two v7x TensorCores).
        n_tiles = pl.cdiv(B, max_batch_block)
        bb = _round_up(pl.cdiv(B, n_tiles), 128)
        b_pad = _round_up(B, bb)
        xt = jnp.pad(xt, ((0, 0), (0, b_pad - B)))
    grid = (b_pad // bb,)

    flops = 2 * b_pad * (TOTAL_FEATURES * HIDDEN
                         + 2 * NUM_RES_BLOCKS * HIDDEN * HIDDEN
                         + HIDDEN * HIDDEN
                         + HIDDEN)
    bytes_accessed = (xt.size * 4 + w_in_t.size * 2 + wstack.size * 2
                      + bstack.size * 4 + b_pad * 4)

    out = pl.pallas_call(
        ilop_decoder_kernel,
        out_shape=jax.ShapeDtypeStruct((1, b_pad), jnp.float32),
        grid=grid,
        in_specs=[
            pl.BlockSpec((TOTAL_FEATURES, bb), lambda i: (0, i)),
            pl.BlockSpec(w_in_t.shape, lambda i: (0, 0)),
            pl.BlockSpec(wstack.shape, lambda i: (0, 0, 0)),
            pl.BlockSpec(bstack.shape, lambda i: (0, 0)),
        ],
        out_specs=pl.BlockSpec((1, bb), lambda i: (0, i)),
        compiler_params=pltpu.CompilerParams(
            dimension_semantics=("parallel",)),
        cost_estimate=pl.CostEstimate(
            flops=flops, transcendentals=0, bytes_accessed=bytes_accessed),
    )(xt, w_in_t, wstack, bstack)

    return out[0, :B].reshape(B, 1)


# --------------------------------------------------------------------------
# Parameter construction (raw PyTorch-like params) + offline folding/packing
# --------------------------------------------------------------------------
def _bn_affine(gamma, beta, mean, var):
    scale = gamma / jnp.sqrt(var + BN_EPS)
    shift = beta - mean * scale
    return scale, shift


def make_raw_params(key):
    """Deterministic synthetic parameters (shapes from ILOPDecoder.__init__)."""
    ks = iter(jax.random.split(key, 32))

    def lin(k, fan_in, fan_out):
        kw, kb = jax.random.split(k)
        w = jax.random.normal(kw, (fan_in, fan_out), jnp.float32) * 0.05
        b = jax.random.normal(kb, (1, fan_out), jnp.float32) * 0.05
        return w, b

    def bn(k, feats):
        kg, kb, km, kv = jax.random.split(k, 4)
        gamma = 1.0 + 0.1 * jax.random.normal(kg, (1, feats), jnp.float32)
        beta = 0.1 * jax.random.normal(kb, (1, feats), jnp.float32)
        mean = 0.1 * jax.random.normal(km, (1, feats), jnp.float32)
        var = 1.0 + 0.1 * jax.random.uniform(kv, (1, feats), jnp.float32)
        return gamma, beta, mean, var

    p = {}
    p["w_in"], p["b_in"] = lin(next(ks), TOTAL_FEATURES, HIDDEN)
    p["bn_in"] = bn(next(ks), HIDDEN)
    p["res"] = []
    for _ in range(NUM_RES_BLOCKS):
        blk = {}
        blk["w1"], blk["b1"] = lin(next(ks), HIDDEN, HIDDEN)
        blk["bn1"] = bn(next(ks), HIDDEN)
        blk["w2"], blk["b2"] = lin(next(ks), HIDDEN, HIDDEN)
        blk["bn2"] = bn(next(ks), HIDDEN)
        p["res"].append(blk)
    p["wf1"], p["bf1"] = lin(next(ks), HIDDEN, HIDDEN_HALF)
    p["wf2"], p["bf2"] = lin(next(ks), HIDDEN_HALF, 1)
    return p


def fold_and_pack(p):
    """Fold eval-mode BN + bias into weights; pre-transpose; pack into 3 arrays."""
    def fold(w, b, bn_params):
        s, t = _bn_affine(*bn_params)
        return w * s, b * s + t

    # input layer: fold BN, transpose to (HIDDEN, TOTAL_FEATURES), bf16.
    w_in_eff, b_in_eff = fold(p["w_in"], p["b_in"], p["bn_in"])
    w_in_t = w_in_eff.T.astype(jnp.bfloat16)                 # (H, 8)

    w_slots, b_cols = [], [b_in_eff[0]]
    for blk in p["res"]:
        w1e, b1e = fold(blk["w1"], blk["b1"], blk["bn1"])
        w2e, b2e = fold(blk["w2"], blk["b2"], blk["bn2"])
        w_slots += [w1e.T, w2e.T]
        b_cols += [b1e[0], b2e[0]]

    # final linear1 (H -> H/2), transposed + zero-padded to (H, H)
    wf1_t = jnp.zeros((HIDDEN, HIDDEN), jnp.float32).at[:HIDDEN_HALF, :].set(p["wf1"].T)
    bf1_pad = jnp.zeros((HIDDEN,), jnp.float32).at[:HIDDEN_HALF].set(p["bf1"][0])
    w_slots.append(wf1_t)
    b_cols.append(bf1_pad)

    # final linear2 (H/2 -> 1): weight as a zero-padded (H,) column, bias scalar
    wf2_col = jnp.zeros((HIDDEN,), jnp.float32).at[:HIDDEN_HALF].set(p["wf2"][:, 0])
    b_cols.append(wf2_col)                                   # col 8
    b_cols.append(jnp.full((HIDDEN,), p["bf2"][0, 0], jnp.float32))  # col 9

    wstack = jnp.stack(w_slots).astype(jnp.bfloat16)         # (7, H, H)
    bstack = jnp.stack(b_cols, axis=1).astype(jnp.float32)   # (H, 10)
    return w_in_t, wstack, bstack


# --------------------------------------------------------------------------
# References (correctness checks)
# --------------------------------------------------------------------------
def reference_forward_f32(x, clinical, p):
    """Pure-f32 JAX mirror of the PyTorch module (eval mode)."""
    def bn(h, bn_params):
        s, t = _bn_affine(*bn_params)
        return h * s + t

    h = jnp.concatenate([x, clinical], axis=1)
    h = jnp.maximum(bn(h @ p["w_in"] + p["b_in"], p["bn_in"]), 0.0)
    for blk in p["res"]:
        y = jnp.maximum(bn(h @ blk["w1"] + blk["b1"], blk["bn1"]), 0.0)
        y = bn(y @ blk["w2"] + blk["b2"], blk["bn2"])
        h = jnp.maximum(y + h, 0.0)
    z = jnp.maximum(h @ p["wf1"] + p["bf1"], 0.0)
    return z @ p["wf2"] + p["bf2"]


def reference_forward_packed(x, clinical, w_in_t, wstack, bstack):
    """Plain-JAX replica of the kernel's exact numerics (bf16 MXU / f32 acc)."""
    f32, bf16 = jnp.float32, jnp.bfloat16
    xt = jnp.concatenate([x, clinical], axis=1).T.astype(bf16)
    h = jnp.dot(w_in_t, xt, preferred_element_type=f32) + bstack[:, 0:1]
    h = jnp.maximum(h, 0.0)
    for i in range(NUM_RES_BLOCKS):
        y = (jnp.dot(wstack[2 * i], h.astype(bf16), preferred_element_type=f32)
             + bstack[:, 1 + 2 * i:2 + 2 * i])
        y = jnp.maximum(y, 0.0)
        y = (jnp.dot(wstack[2 * i + 1], y.astype(bf16), preferred_element_type=f32)
             + bstack[:, 2 + 2 * i:3 + 2 * i])
        h = jnp.maximum(y + h, 0.0)
    z = (jnp.dot(wstack[2 * NUM_RES_BLOCKS], h.astype(bf16),
                 preferred_element_type=f32)
         + bstack[:, 1 + 2 * NUM_RES_BLOCKS:2 + 2 * NUM_RES_BLOCKS])
    z = jnp.maximum(z, 0.0)
    out = jnp.sum(z * bstack[:, 8:9], axis=0, keepdims=True) + bstack[0:1, 9:10]
    return out[0].reshape(-1, 1)


# --------------------------------------------------------------------------
if __name__ == "__main__":
    key = jax.random.PRNGKey(0)
    kx, kc, kp = jax.random.split(key, 3)
    x = jax.random.normal(kx, (BATCH, INPUT_FEATURES), jnp.float32)
    clinical = jax.random.normal(kc, (BATCH, CLINICAL_FEATURES), jnp.float32)

    raw = make_raw_params(kp)
    w_in_t, wstack, bstack = fold_and_pack(raw)

    out = ilop_decoder_forward(x, clinical, w_in_t, wstack, bstack)
    out = jax.block_until_ready(out)
    assert out.shape == (BATCH, 1), out.shape

    # Exact-numerics check (same bf16 matmul / f32 accumulate as the kernel).
    ref_packed = reference_forward_packed(x, clinical, w_in_t, wstack, bstack)
    assert jnp.allclose(out, ref_packed, atol=1e-3, rtol=1e-3), (out, ref_packed)

    # Full-precision PyTorch-semantics check (bf16 weights => loose tolerance).
    ref_f32 = reference_forward_f32(x, clinical, raw)
    assert jnp.allclose(out, ref_f32, atol=2e-2, rtol=2e-2), (out, ref_f32)

    print("KERNEL_OK")
</pallas_src>

<mosaic_0001>
module attributes {stable_mosaic.version = 11 : i64} {
  func.func @ilop_decoder_kernel(%arg0: i32, %arg1: memref<8x2xf32, #tpu.memory_space<vmem>>, %arg2: memref<32x8xbf16, #tpu.memory_space<vmem>>, %arg3: memref<7x32x32xbf16, #tpu.memory_space<vmem>>, %arg4: memref<32x10xf32, #tpu.memory_space<vmem>>, %arg5: memref<1x2xf32, #tpu.memory_space<vmem>>) attributes {dimension_semantics = [#tpu.dimension_semantics<parallel>], iteration_bounds = array<i64: 1>, scalar_prefetch = 0 : i64, scratch_operands = 0 : i64, tpu.core_type = #tpu.core_type<tc>, window_params = [{transform_indices = @transform_0, window_bounds = array<i64: 8, 2>}, {pipeline_mode = #tpu.pipeline_mode<synchronous>, transform_indices = @transform_1, window_bounds = array<i64: 32, 8>}, {pipeline_mode = #tpu.pipeline_mode<synchronous>, transform_indices = @transform_2, window_bounds = array<i64: 7, 32, 32>}, {pipeline_mode = #tpu.pipeline_mode<synchronous>, transform_indices = @transform_3, window_bounds = array<i64: 32, 10>}, {transform_indices = @transform_4, window_bounds = array<i64: 1, 2>}]} {
    %c0 = arith.constant 0 : index
    %c0_0 = arith.constant 0 : index
    %0 = vector.load %arg1[%c0, %c0_0] : memref<8x2xf32, #tpu.memory_space<vmem>>, vector<8x2xf32>
    %1 = arith.truncf %0 : vector<8x2xf32> to vector<8x2xbf16>
    %c0_1 = arith.constant 0 : index
    %c0_2 = arith.constant 0 : index
    %2 = vector.load %arg2[%c0_1, %c0_2] : memref<32x8xbf16, #tpu.memory_space<vmem>>, vector<32x8xbf16>
    %cst = arith.constant dense<0.000000e+00> : vector<32x2xf32>
    %3 = tpu.matmul %2, %1, %cst {dimension_numbers = #tpu.dot_dimension_numbers<[1], [0], [0], [1], [0, 0, 1, 1], [], []>} : vector<32x8xbf16>, vector<8x2xbf16>, vector<32x2xf32> -> vector<32x2xf32>
    %c0_3 = arith.constant 0 : index
    %c0_4 = arith.constant 0 : index
    %4 = vector.load %arg4[%c0_3, %c0_4] : memref<32x10xf32, #tpu.memory_space<vmem>>, vector<32x1xf32>
    %5 = vector.broadcast %4 : vector<32x1xf32> to vector<32x2xf32>
    %6 = arith.addf %3, %5 : vector<32x2xf32>
    %cst_5 = arith.constant 0.000000e+00 : f32
    %7 = vector.broadcast %cst_5 : f32 to vector<32x2xf32>
    %8 = arith.maximumf %6, %7 : vector<32x2xf32>
    %c0_6 = arith.constant 0 : index
    %c0_7 = arith.constant 0 : index
    %c0_8 = arith.constant 0 : index
    %9 = vector.load %arg3[%c0_6, %c0_7, %c0_8] : memref<7x32x32xbf16, #tpu.memory_space<vmem>>, vector<1x32x32xbf16>
    %10 = vector.shape_cast %9 : vector<1x32x32xbf16> to vector<32x32xbf16>
    %11 = arith.truncf %8 : vector<32x2xf32> to vector<32x2xbf16>
    %cst_9 = arith.constant dense<0.000000e+00> : vector<32x2xf32>
    %12 = tpu.matmul %10, %11, %cst_9 {dimension_numbers = #tpu.dot_dimension_numbers<[1], [0], [0], [1], [0, 0, 1, 1], [], []>} : vector<32x32xbf16>, vector<32x2xbf16>, vector<32x2xf32> -> vector<32x2xf32>
    %c0_10 = arith.constant 0 : index
    %c1 = arith.constant 1 : index
    %13 = vector.load %arg4[%c0_10, %c1] : memref<32x10xf32, #tpu.memory_space<vmem>>, vector<32x1xf32>
    %14 = vector.broadcast %13 : vector<32x1xf32> to vector<32x2xf32>
    %15 = arith.addf %12, %14 : vector<32x2xf32>
    %cst_11 = arith.constant 0.000000e+00 : f32
    %16 = vector.broadcast %cst_11 : f32 to vector<32x2xf32>
    %17 = arith.maximumf %15, %16 : vector<32x2xf32>
    %c1_12 = arith.constant 1 : index
    %c0_13 = arith.constant 0 : index
    %c0_14 = arith.constant 0 : index
    %18 = vector.load %arg3[%c1_12, %c0_13, %c0_14] : memref<7x32x32xbf16, #tpu.memory_space<vmem>>, vector<1x32x32xbf16>
    %19 = vector.shape_cast %18 : vector<1x32x32xbf16> to vector<32x32xbf16>
    %20 = arith.truncf %17 : vector<32x2xf32> to vector<32x2xbf16>
    %cst_15 = arith.constant dense<0.000000e+00> : vector<32x2xf32>
    %21 = tpu.matmul %19, %20, %cst_15 {dimension_numbers = #tpu.dot_dimension_numbers<[1], [0], [0], [1], [0, 0, 1, 1], [], []>} : vector<32x32xbf16>, vector<32x2xbf16>, vector<32x2xf32> -> vector<32x2xf32>
    %c0_16 = arith.constant 0 : index
    %c2 = arith.constant 2 : index
    %22 = vector.load %arg4[%c0_16, %c2] : memref<32x10xf32, #tpu.memory_space<vmem>>, vector<32x1xf32>
    %23 = vector.broadcast %22 : vector<32x1xf32> to vector<32x2xf32>
    %24 = arith.addf %21, %23 : vector<32x2xf32>
    %25 = arith.addf %24, %8 : vector<32x2xf32>
    %cst_17 = arith.constant 0.000000e+00 : f32
    %26 = vector.broadcast %cst_17 : f32 to vector<32x2xf32>
    %27 = arith.maximumf %25, %26 : vector<32x2xf32>
    %c2_18 = arith.constant 2 : index
    %c0_19 = arith.constant 0 : index
    %c0_20 = arith.constant 0 : index
    %28 = vector.load %arg3[%c2_18, %c0_19, %c0_20] : memref<7x32x32xbf16, #tpu.memory_space<vmem>>, vector<1x32x32xbf16>
    %29 = vector.shape_cast %28 : vector<1x32x32xbf16> to vector<32x32xbf16>
    %30 = arith.truncf %27 : vector<32x2xf32> to vector<32x2xbf16>
    %cst_21 = arith.constant dense<0.000000e+00> : vector<32x2xf32>
    %31 = tpu.matmul %29, %30, %cst_21 {dimension_numbers = #tpu.dot_dimension_numbers<[1], [0], [0], [1], [0, 0, 1, 1], [], []>} : vector<32x32xbf16>, vector<32x2xbf16>, vector<32x2xf32> -> vector<32x2xf32>
    %c0_22 = arith.constant 0 : index
    %c3 = arith.constant 3 : index
    %32 = vector.load %arg4[%c0_22, %c3] : memref<32x10xf32, #tpu.memory_space<vmem>>, vector<32x1xf32>
    %33 = vector.broadcast %32 : vector<32x1xf32> to vector<32x2xf32>
    %34 = arith.addf %31, %33 : vector<32x2xf32>
    %cst_23 = arith.constant 0.000000e+00 : f32
    %35 = vector.broadcast %cst_23 : f32 to vector<32x2xf32>
    %36 = arith.maximumf %34, %35 : vector<32x2xf32>
    %c3_24 = arith.constant 3 : index
    %c0_25 = arith.constant 0 : index
    %c0_26 = arith.constant 0 : index
    %37 = vector.load %arg3[%c3_24, %c0_25, %c0_26] : memref<7x32x32xbf16, #tpu.memory_space<vmem>>, vector<1x32x32xbf16>
    %38 = vector.shape_cast %37 : vector<1x32x32xbf16> to vector<32x32xbf16>
    %39 = arith.truncf %36 : vector<32x2xf32> to vector<32x2xbf16>
    %cst_27 = arith.constant dense<0.000000e+00> : vector<32x2xf32>
    %40 = tpu.matmul %38, %39, %cst_27 {dimension_numbers = #tpu.dot_dimension_numbers<[1], [0], [0], [1], [0, 0, 1, 1], [], []>} : vector<32x32xbf16>, vector<32x2xbf16>, vector<32x2xf32> -> vector<32x2xf32>
    %c0_28 = arith.constant 0 : index
    %c4 = arith.constant 4 : index
    %41 = vector.load %arg4[%c0_28, %c4] : memref<32x10xf32, #tpu.memory_space<vmem>>, vector<32x1xf32>
    %42 = vector.broadcast %41 : vector<32x1xf32> to vector<32x2xf32>
    %43 = arith.addf %40, %42 : vector<32x2xf32>
    %44 = arith.addf %43, %27 : vector<32x2xf32>
    %cst_29 = arith.constant 0.000000e+00 : f32
    %45 = vector.broadcast %cst_29 : f32 to vector<32x2xf32>
    %46 = arith.maximumf %44, %45 : vector<32x2xf32>
    %c4_30 = arith.constant 4 : index
    %c0_31 = arith.constant 0 : index
    %c0_32 = arith.constant 0 : index
    %47 = vector.load %arg3[%c4_30, %c0_31, %c0_32] : memref<7x32x32xbf16, #tpu.memory_space<vmem>>, vector<1x32x32xbf16>
    %48 = vector.shape_cast %47 : vector<1x32x32xbf16> to vector<32x32xbf16>
    %49 = arith.truncf %46 : vector<32x2xf32> to vector<32x2xbf16>
    %cst_33 = arith.constant dense<0.000000e+00> : vector<32x2xf32>
    %50 = tpu.matmul %48, %49, %cst_33 {dimension_numbers = #tpu.dot_dimension_numbers<[1], [0], [0], [1], [0, 0, 1, 1], [], []>} : vector<32x32xbf16>, vector<32x2xbf16>, vector<32x2xf32> -> vector<32x2xf32>
    %c0_34 = arith.constant 0 : index
    %c5 = arith.constant 5 : index
    %51 = vector.load %arg4[%c0_34, %c5] : memref<32x10xf32, #tpu.memory_space<vmem>>, vector<32x1xf32>
    %52 = vector.broadcast %51 : vector<32x1xf32> to vector<32x2xf32>
    %53 = arith.addf %50, %52 : vector<32x2xf32>
    %cst_35 = arith.constant 0.000000e+00 : f32
    %54 = vector.broadcast %cst_35 : f32 to vector<32x2xf32>
    %55 = arith.maximumf %53, %54 : vector<32x2xf32>
    %c5_36 = arith.constant 5 : index
    %c0_37 = arith.constant 0 : index
    %c0_38 = arith.constant 0 : index
    %56 = vector.load %arg3[%c5_36, %c0_37, %c0_38] : memref<7x32x32xbf16, #tpu.memory_space<vmem>>, vector<1x32x32xbf16>
    %57 = vector.shape_cast %56 : vector<1x32x32xbf16> to vector<32x32xbf16>
    %58 = arith.truncf %55 : vector<32x2xf32> to vector<32x2xbf16>
    %cst_39 = arith.constant dense<0.000000e+00> : vector<32x2xf32>
    %59 = tpu.matmul %57, %58, %cst_39 {dimension_numbers = #tpu.dot_dimension_numbers<[1], [0], [0], [1], [0, 0, 1, 1], [], []>} : vector<32x32xbf16>, vector<32x2xbf16>, vector<32x2xf32> -> vector<32x2xf32>
    %c0_40 = arith.constant 0 : index
    %c6 = arith.constant 6 : index
    %60 = vector.load %arg4[%c0_40, %c6] : memref<32x10xf32, #tpu.memory_space<vmem>>, vector<32x1xf32>
    %61 = vector.broadcast %60 : vector<32x1xf32> to vector<32x2xf32>
    %62 = arith.addf %59, %61 : vector<32x2xf32>
    %63 = arith.addf %62, %46 : vector<32x2xf32>
    %cst_41 = arith.constant 0.000000e+00 : f32
    %64 = vector.broadcast %cst_41 : f32 to vector<32x2xf32>
    %65 = arith.maximumf %63, %64 : vector<32x2xf32>
    %c6_42 = arith.constant 6 : index
    %c0_43 = arith.constant 0 : index
    %c0_44 = arith.constant 0 : index
    %66 = vector.load %arg3[%c6_42, %c0_43, %c0_44] : memref<7x32x32xbf16, #tpu.memory_space<vmem>>, vector<1x32x32xbf16>
    %67 = vector.shape_cast %66 : vector<1x32x32xbf16> to vector<32x32xbf16>
    %68 = arith.truncf %65 : vector<32x2xf32> to vector<32x2xbf16>
    %cst_45 = arith.constant dense<0.000000e+00> : vector<32x2xf32>
    %69 = tpu.matmul %67, %68, %cst_45 {dimension_numbers = #tpu.dot_dimension_numbers<[1], [0], [0], [1], [0, 0, 1, 1], [], []>} : vector<32x32xbf16>, vector<32x2xbf16>, vector<32x2xf32> -> vector<32x2xf32>
    %c0_46 = arith.constant 0 : index
    %c7 = arith.constant 7 : index
    %70 = vector.load %arg4[%c0_46, %c7] : memref<32x10xf32, #tpu.memory_space<vmem>>, vector<32x1xf32>
    %71 = vector.broadcast %70 : vector<32x1xf32> to vector<32x2xf32>
    %72 = arith.addf %69, %71 : vector<32x2xf32>
    %cst_47 = arith.constant 0.000000e+00 : f32
    %73 = vector.broadcast %cst_47 : f32 to vector<32x2xf32>
    %74 = arith.maximumf %72, %73 : vector<32x2xf32>
    %c0_48 = arith.constant 0 : index
    %c8 = arith.constant 8 : index
    %75 = vector.load %arg4[%c0_48, %c8] : memref<32x10xf32, #tpu.memory_space<vmem>>, vector<32x1xf32>
    %76 = vector.broadcast %75 : vector<32x1xf32> to vector<32x2xf32>
    %77 = arith.mulf %74, %76 : vector<32x2xf32>
    %cst_49 = arith.constant dense<0.000000e+00> : vector<2xf32>
    %78 = vector.multi_reduction <add>, %77, %cst_49 [0] : vector<32x2xf32> to vector<2xf32>
    %79 = vector.shape_cast %78 : vector<2xf32> to vector<1x2xf32>
    %c0_50 = arith.constant 0 : index
    %c9 = arith.constant 9 : index
    %80 = vector.load %arg4[%c0_50, %c9] : memref<32x10xf32, #tpu.memory_space<vmem>>, vector<1x1xf32>
    %81 = vector.broadcast %80 : vector<1x1xf32> to vector<1x2xf32>
    %82 = arith.addf %79, %81 : vector<1x2xf32>
    %c0_51 = arith.constant 0 : index
    %c0_52 = arith.constant 0 : index
    %83 = vector.load %arg5[%c0_51, %c0_52] : memref<1x2xf32, #tpu.memory_space<vmem>>, vector<1x2xf32>
    tpu.vector_store %arg5[%c0_51, %c0_52], %82 {strides = array<i32>} : memref<1x2xf32, #tpu.memory_space<vmem>>, vector<1x2xf32>,
    return
  }
  func.func @transform_0(%arg0: i32) -> (i32, i32) {
    %c0_i32 = arith.constant 0 : i32
    %c0_i32_0 = arith.constant 0 : i32
    return %c0_i32, %arg0 : i32, i32
  }
  func.func @transform_1(%arg0: i32) -> (i32, i32) {
    %c0_i32 = arith.constant 0 : i32
    %c0_i32_0 = arith.constant 0 : i32
    %c0_i32_1 = arith.constant 0 : i32
    return %c0_i32, %c0_i32_0 : i32, i32
  }
  func.func @transform_2(%arg0: i32) -> (i32, i32, i32) {
    %c0_i32 = arith.constant 0 : i32
    %c0_i32_0 = arith.constant 0 : i32
    %c0_i32_1 = arith.constant 0 : i32
    %c0_i32_2 = arith.constant 0 : i32
    return %c0_i32, %c0_i32_0, %c0_i32_1 : i32, i32, i32
  }
  func.func @transform_3(%arg0: i32) -> (i32, i32) {
    %c0_i32 = arith.constant 0 : i32
    %c0_i32_0 = arith.constant 0 : i32
    %c0_i32_1 = arith.constant 0 : i32
    return %c0_i32, %c0_i32_0 : i32, i32
  }
  func.func @transform_4(%arg0: i32) -> (i32, i32) {
    %c0_i32 = arith.constant 0 : i32
    %c0_i32_0 = arith.constant 0 : i32
    return %c0_i32, %arg0 : i32, i32
  }
}

</mosaic_0001>

<bundles_post_ra>
// kernel: tpu_custom_call.1
= control target key start
LH: loop header
LB: loop body
LE: loop exit
PB: predicated region body
PF: predicated region fallthrough
CT: control target
= control target key end

     0   :  { %9 = vsyncpa [#allocation3], 0  ;;  %s1303_s0 = inlined_call_operand.vmem [shape: f32[8,2], index: 0, kind: input, shape index: {}]   ;;  %s1304_s1 = inlined_call_operand.vmem [shape: bf16[32,8], index: 1, kind: input, shape index: {}]   ;;  %s1305_s2 = inlined_call_operand.hbm [shape: bf16[7,32,32], index: 2, kind: input, shape index: {}]   ;;  %s1306_s3 = inlined_call_operand.vmem [shape: f32[32,10], index: 3, kind: input, shape index: {}]   ;;  %s1307_s4 = inlined_call_operand.hbm [shape: f32[1,2], index: 4, kind: output, shape index: {}]  }
   0x1   :  { %10 = vsyncpa [#allocation4], 0  ;;  %s1074_s15 = smov [#allocation2]   ;;  %s1026_s19 = scalar_lea.hbm %s1305_s2, 1792 }
   0x2   :  { %s20_s16 = sshll.u32 %s1074_s15, 4  ;;  %p1027_p0 = scmp.ne.s32.totalorder %s1305_s2, %s1026_s19  ;;  %s21_s16 = int_to_ptr.vmem [resolvable:$true] %s20_s16 }
   0x3   :  { %p1030_p1 = scmp.lt.u32.totalorder %s1026_s19, %s1305_s2 }
   0x5   :  { %p1032_p2 = pnand %p1030_p1, %p1027_p0 }
   0x7   :  { %1035 = shalt.err (!%p1032_p2)
}
   0x8   :  { %s1036_s24 = scalar_lea.vmem %s21_s16, 1792  ;;  %p1041_p4 = scmp.lt.s32.totalorder %s21_s16, %s21_s16 }
   0x9   :  { %p1037_p3 = scmp.ne.s32.totalorder %s21_s16, %s1036_s24  ;;  %p1042_p5 = scmp.lt.s32.totalorder %s1036_s24, %s1036_s24 }
   0xb   :  { %p1043_p6 = por %p1042_p5, %p1041_p4 }
   0xd   :  { %p1044_p7 = pnand %p1043_p6, %p1037_p3 }
   0xf   :  { %1047 = shalt.err (!%p1044_p7)
}
  0x10   :  { %s1075_s25 = smov 64   ;;  %s1076_s26 = smov 4  }
  0x11   :  { %26 = dma.hbm_to_vmem [thread:$0]  %s1305_s2, 1792, %s21_s16, [#allocation3], %s1075_s25, %s1075_s25, %s1076_s26  }
  0x12   :  { %1070 = dma.done.wait [#allocation3], 1792  }
  0x13   :  { %1071 = vsyncadd [#allocation3], 4294965504  ;;  %v1077_v0 = vmov 0   ;;  %vm80_vm0 = vcmask 1043456   ;;  %v33_v1 = vld [vmem:[%s1303_s0] sm:$0xff]  ;;  %vm73_vm1 = vcmask 64512  }
  0x14   :  { %991 = vset.pattern.permute.xlu0 %v1077_v0  ;;  %992 = vset.pattern.permute.xlu1 %v1077_v0  ;;  %v34_v2 = vpack.c.bf16 %v33_v1, %v33_v1  ;;  %v1010_v3 = vld [vmem:[%s1304_s1] sm:$0xff]   ;;  %v1139_v5 = vld [vmem:[%s1306_s3 + $0x10] sm:$0xff]  ;;  %v1011_v7 = vld [vmem:[%s1304_s1 + $0x8] sm:$0xff]   ;;  %vm169_vm2 = vcmask 261120   ;;  %v1078_v11 = vmov 1   ;;  %v1079_v32 = vmov 2  }
  0x15   :  { %v1134_v4 = vld [vmem:[%s1306_s3] sm:$0xff]  ;;  %916 = vmatprep.mubr.msk.bf16.mxu0 %vm73_vm1, %v1010_v3  ;;  %v1147_v8 = vld [vmem:[%s1306_s3 + $0x8] sm:$0xff]  ;;  %v1153_v9 = vld [vmem:[%s1306_s3 + $0x18] sm:$0xff]  ;;  %55 = vperm.xlu1 %992, %v1139_v5   ;;  %v1080_v53 = vmov 3   ;;  %vm813_vm3 = vcmask 15360   ;;  %vm834_vm4 = vcmask 8192  }
  0x16   :  { %976 = vmatprep.subr.msk.bf16.mxu0 %vm80_vm0, %v34_v2  ;;  %v82_v6 = vsel %vm80_vm0, %v34_v2, 0  ;;  %45 = vperm.xlu0 %991, %v1134_v4   ;;  %v1012_v10 = vld [vmem:[#allocation2] sm:$0xff]   ;;  %v1013_v30 = vld [vmem:[#allocation2 + $0x8] sm:$0xff]   ;;  %v1014_v31 = vld [vmem:[#allocation2 + $0x10] sm:$0xff]  }
  0x17   :  { %915 = vmatpush3.bf16.msra.mxu0 %v82_v6  ;;  %924 = vmatprep.mubr.msk.bf16.mxu1 %vm169_vm2, %v1012_v10  ;;  %v1015_v51 = vld [vmem:[#allocation2 + $0x18] sm:$0xff]   ;;  %v1016_v52 = vld [vmem:[#allocation2 + $0x20] sm:$0xff]  }
  0x19   :  { %60 = vperm.xlu1 %992, %v1153_v9  }
  0x1a   :  { %917 = vmatmul.mubr.msk.bf16.vlgmr.msra.gmra.mrb[0].mxu0 %vm73_vm1, %v1011_v7  ;;  %50 = vperm.xlu0 %991, %v1147_v8  }
  0x1b   :  { %932 = vmatprep.mubr.msk.bf16.mxu0 %vm169_vm2, %v1014_v31 }
  0x1d   :  { %994 = vset.pattern.permute.xlu1 %v1078_v11 }
  0x1e   :  { %993 = vset.pattern.permute.xlu0 %v1078_v11  ;;  %148 = vperm.xlu1 %994, %v1147_v8  }
  0x1f   :  { %144 = vperm.xlu0 %993, %v1134_v4  }
  0x22   :  { %152 = vperm.xlu1 %994, %v1139_v5  }
  0x23   :  { %156 = vperm.xlu0 %993, %v1153_v9  }
  0x26   :  { %995 = vset.pattern.permute.xlu1 %v1079_v32 }
  0x27   :  { %996 = vset.pattern.permute.xlu0 %v1079_v32  ;;  %237 = vperm.xlu1 %995, %v1134_v4  }
  0x28   :  { %241 = vperm.xlu0 %996, %v1147_v8  }
  0x2b   :  { %245 = vperm.xlu1 %995, %v1139_v5  }
  0x2c   :  { %997 = vset.pattern.permute.xlu0 %v1080_v53 }
  0x2d   :  { %333 = vperm.xlu0 %997, %v1134_v4  }
  0x2f   :  { %249 = vperm.xlu1 %995, %v1153_v9  }
  0x31   :  { %345 = vperm.xlu0 %997, %v1153_v9  }
  0x33   :  { %998 = vset.pattern.permute.xlu1 %v1080_v53 }
  0x34   :  { %337 = vperm.xlu1 %998, %v1147_v8  }
  0x38   :  { %341 = vperm.xlu1 %998, %v1139_v5  }
  0x94   :  { %v56_v12 = vpop.permute.xlu1 %55 }
  0x95   :  { %v46_v13 = vpop.permute.xlu0 %45 }
  0x98   :  { %v61_v15 = vpop.permute.xlu1 %60 }
  0x99   :  { %v51_v19 = vpop.permute.xlu0 %50 }
  0x9d   :  { %v149_v33 = vpop.permute.xlu1 %148 }
  0x9e   :  { %v145_v34 = vpop.permute.xlu0 %144 }
  0xa1   :  { %v153_v35 = vpop.permute.xlu1 %152 }
  0xa2   :  { %v157_v37 = vpop.permute.xlu0 %156 }
  0xa6   :  { %v238_v54 = vpop.permute.xlu1 %237 }
  0xa7   :  { %v242_v58 = vpop.permute.xlu0 %241 }
  0xaa   :  { %v246_v55 = vpop.permute.xlu1 %245 }
  0xae   :  { %v250_v59 = vpop.permute.xlu1 %249 }
  0xed   :  { %v918_v14 = vpop.f32.mrb[0].mxu0 }
  0xee   :  { %v118_v16 = vpop.f32.mrb[1].mxu0  ;;  %v1167_v22 = vadd.f32 %v918_v14, %v56_v12 }
  0xef   :  { %v1163_v17 = vadd.f32 %v118_v16, %v46_v13  ;;  %v919_v18 = vpop.f32.mrb[2].mxu0  ;;  %v1017_v16 = vld [vmem:[#allocation2 + $0x28] sm:$0xff]  }
  0xf0   :  { %v1165_v20 = vadd.f32 %v919_v18, %v61_v15  ;;  %v121_v21 = vpop.f32.mrb[3].mxu0  ;;  %v135_v27 = vmax.f32 %v1167_v22, 0.0  ;;  %v1081_v18 = vmov 4  }
  0xf1   :  { %v1169_v23 = vadd.f32 %v121_v21, %v51_v19  ;;  %v133_v24 = vmax.f32 %v1163_v17, 0.0  ;;  %v1018_v17 = vld [vmem:[#allocation2 + $0x30] sm:$0xff]   ;;  %999 = vset.pattern.permute.xlu1 %v1081_v18  ;;  %1000 = vset.pattern.permute.xlu0 %v1081_v18  ;;  %v338_v19 = vpop.permute.xlu1 %337 }
  0xf2   :  { %v136_v25 = vmax.f32 %v1165_v20, 0.0  ;;  %425 = vperm.xlu1 %999, %v1134_v4   ;;  %429 = vperm.xlu0 %1000, %v1147_v8   ;;  %v334_v20 = vpop.permute.xlu0 %333 }
  0xf3   :  { %v134_v26 = vmax.f32 %v1169_v23, 0.0 }
  0xf4   :  { %v142_v29 = vpack.c.bf16 %v136_v25, %v135_v27 }
  0xf5   :  { %v141_v28 = vpack.c.bf16 %v134_v26, %v133_v24  ;;  %v342_v21 = vpop.permute.xlu1 %341 }
  0xf6   :  { %433 = vperm.xlu1 %999, %v1139_v5   ;;  %v346_v23 = vpop.permute.xlu0 %345 }
  0xf7   :  { %920 = vmatprep.subr.bf16.mxu1 %v141_v28 }
  0xf8   :  { %921 = vmatpush3.bf16.msra.mxu1 %v141_v28 }
  0xf9   :  { %922 = vmatprep.subr.bf16.mxu1 %v142_v29 }
  0xfa   :  { %437 = vperm.xlu1 %999, %v1153_v9  }
  0xfc   :  { %923 = vmatpush3.bf16.msra.mxu1 %v142_v29 }
  0xff   :  { %925 = vmatmul.mubr.msk.bf16.vlgmr.msra.gmra.mrb[0].mxu1 %vm169_vm2, %v1013_v30 }
 0x100   :  { %940 = vmatprep.mubr.msk.bf16.mxu1 %vm169_vm2, %v1016_v52 }
 0x1d2   :  { %v926_v36 = vpop.f32.mrb[0].mxu1 }
 0x1d3   :  { %v219_v38 = vadd.f32 %v926_v36, %v153_v35  ;;  %v210_v39 = vpop.f32.mrb[1].mxu1 }
 0x1d4   :  { %v211_v40 = vadd.f32 %v210_v39, %v145_v34  ;;  %v927_v41 = vpop.f32.mrb[2].mxu1  ;;  %v1082_v39 = vmov 5  }
 0x1d5   :  { %v222_v42 = vadd.f32 %v927_v41, %v157_v37  ;;  %v213_v43 = vpop.f32.mrb[3].mxu1  ;;  %v227_v45 = vmax.f32 %v219_v38, 0.0  ;;  %v1019_v37 = vld [vmem:[#allocation2 + $0x38] sm:$0xff]   ;;  %v1020_v38 = vld [vmem:[#allocation2 + $0x40] sm:$0xff]   ;;  %1002 = vset.pattern.permute.xlu1 %v1082_v39  ;;  %1001 = vset.pattern.permute.xlu0 %v1082_v39 }
 0x1d6   :  { %v214_v44 = vadd.f32 %v213_v43, %v149_v33  ;;  %v225_v47 = vmax.f32 %v211_v40, 0.0  ;;  %525 = vperm.xlu1 %1002, %v1147_v8   ;;  %521 = vperm.xlu0 %1001, %v1134_v4   ;;  %v426_v40 = vpop.permute.xlu1 %425 }
 0x1d7   :  { %v228_v46 = vmax.f32 %v222_v42, 0.0 }
 0x1d8   :  { %v226_v48 = vmax.f32 %v214_v44, 0.0  ;;  %v430_v44 = vpop.permute.xlu0 %429 }
 0x1d9   :  { %v235_v49 = vpack.c.bf16 %v228_v46, %v227_v45 }
 0x1da   :  { %v234_v50 = vpack.c.bf16 %v226_v48, %v225_v47  ;;  %529 = vperm.xlu1 %1002, %v1139_v5   ;;  %533 = vperm.xlu0 %1001, %v1153_v9   ;;  %v434_v41 = vpop.permute.xlu1 %433 }
 0x1dc   :  { %928 = vmatprep.subr.bf16.mxu0 %v234_v50 }
 0x1dd   :  { %929 = vmatpush3.bf16.msra.mxu0 %v234_v50 }
 0x1de   :  { %930 = vmatprep.subr.bf16.mxu0 %v235_v49  ;;  %v438_v45 = vpop.permute.xlu1 %437 }
 0x1e1   :  { %931 = vmatpush3.bf16.msra.mxu0 %v235_v49 }
 0x1e4   :  { %933 = vmatmul.mubr.msk.bf16.vlgmr.msra.gmra.mrb[4].mxu0 %vm169_vm2, %v1015_v51 }
 0x1e5   :  { %948 = vmatprep.mubr.msk.bf16.mxu0 %vm169_vm2, %v1018_v17 }
 0x2b7   :  { %v934_v56 = vpop.f32.mrb[4].mxu0 }
 0x2b8   :  { %v302_v57 = vpop.f32.mrb[5].mxu0  ;;  %v311_v60 = vadd.f32 %v934_v56, %v246_v55 }
 0x2b9   :  { %v303_v61 = vadd.f32 %v302_v57, %v238_v54  ;;  %v935_v62 = vpop.f32.mrb[6].mxu0 }
 0x2ba   :  { %v314_v63 = vadd.f32 %v935_v62, %v250_v59  ;;  %v305_v0 = vpop.f32.mrb[7].mxu0  ;;  %v1205_v6 = vadd.f32 %v311_v60, %v135_v27  ;;  %v1021_v62 = vld [vmem:[#allocation2 + $0x48] sm:$0xff]  }
 0x2bb   :  { %v1197_v1 = vadd.f32 %v303_v61, %v133_v24  ;;  %v306_v2 = vadd.f32 %v305_v0, %v242_v58  ;;  %v1083_v0 = vmov 6  }
 0x2bc   :  { %v1201_v3 = vadd.f32 %v314_v63, %v136_v25  ;;  %v323_v13 = vmax.f32 %v1205_v6, 0.0  ;;  %v1022_v63 = vld [vmem:[#allocation2 + $0x50] sm:$0xff]   ;;  %1003 = vset.pattern.permute.xlu1 %v1083_v0  ;;  %1004 = vset.pattern.permute.xlu0 %v1083_v0 }
 0x2bd   :  { %v1209_v7 = vadd.f32 %v306_v2, %v134_v26  ;;  %v321_v10 = vmax.f32 %v1197_v1, 0.0  ;;  %613 = vperm.xlu1 %1003, %v1134_v4   ;;  %617 = vperm.xlu0 %1004, %v1147_v8   ;;  %v526_v1 = vpop.permute.xlu1 %525  ;;  %v522_v2 = vpop.permute.xlu0 %521 }
 0x2be   :  { %v324_v11 = vmax.f32 %v1201_v3, 0.0 }
 0x2bf   :  { %v322_v12 = vmax.f32 %v1209_v7, 0.0 }
 0x2c0   :  { %v331_v15 = vpack.c.bf16 %v324_v11, %v323_v13 }
 0x2c1   :  { %v330_v14 = vpack.c.bf16 %v322_v12, %v321_v10  ;;  %621 = vperm.xlu1 %1003, %v1139_v5   ;;  %v530_v3 = vpop.permute.xlu1 %529  ;;  %v534_v7 = vpop.permute.xlu0 %533 }
 0x2c3   :  { %936 = vmatprep.subr.bf16.mxu1 %v330_v14 }
 0x2c4   :  { %937 = vmatpush3.bf16.msra.mxu1 %v330_v14 }
 0x2c5   :  { %938 = vmatprep.subr.bf16.mxu1 %v331_v15  ;;  %625 = vperm.xlu1 %1003, %v1153_v9  }
 0x2c8   :  { %939 = vmatpush3.bf16.msra.mxu1 %v331_v15 }
 0x2cb   :  { %941 = vmatmul.mubr.msk.bf16.vlgmr.msra.gmra.mrb[4].mxu1 %vm169_vm2, %v1017_v16 }
 0x2cc   :  { %956 = vmatprep.mubr.msk.bf16.mxu1 %vm169_vm2, %v1020_v38 }
 0x39e   :  { %v942_v22 = vpop.f32.mrb[4].mxu1 }
 0x39f   :  { %v407_v24 = vadd.f32 %v942_v22, %v342_v21  ;;  %v398_v25 = vpop.f32.mrb[5].mxu1 }
 0x3a0   :  { %v399_v26 = vadd.f32 %v398_v25, %v334_v20  ;;  %v943_v27 = vpop.f32.mrb[6].mxu1  ;;  %v1084_v25 = vmov 7  }
 0x3a1   :  { %v410_v28 = vadd.f32 %v943_v27, %v346_v23  ;;  %v401_v29 = vpop.f32.mrb[7].mxu1  ;;  %v415_v31 = vmax.f32 %v407_v24, 0.0  ;;  %v1023_v23 = vld [vmem:[#allocation2 + $0x58] sm:$0xff]   ;;  %v1024_v24 = vld [vmem:[#allocation2 + $0x60] sm:$0xff]   ;;  %1006 = vset.pattern.permute.xlu1 %v1084_v25  ;;  %1005 = vset.pattern.permute.xlu0 %v1084_v25 }
 0x3a2   :  { %v402_v30 = vadd.f32 %v401_v29, %v338_v19  ;;  %v413_v33 = vmax.f32 %v399_v26, 0.0  ;;  %713 = vperm.xlu1 %1006, %v1147_v8   ;;  %709 = vperm.xlu0 %1005, %v1134_v4   ;;  %v1085_v26 = vmov 8   ;;  %v827_v27 = vld [vmem:[%s1306_s3] sm:$0x1]  ;;  %v614_v29 = vpop.permute.xlu1 %613  ;;  %s1087_s3 = smov [#allocation5]  }
 0x3a3   :  { %v416_v32 = vmax.f32 %v410_v28, 0.0  ;;  %v1086_v28 = vmov 9   ;;  %s842_s16 = sshll.u32 %s1087_s3, 4  ;;  %s843_s16 = int_to_ptr.vmem [resolvable:$true] %s842_s16 }
 0x3a4   :  { %v414_v34 = vmax.f32 %v402_v30, 0.0  ;;  %s1048_s17 = scalar_lea.vmem %s843_s16, 16  ;;  %s1052_s18 = scalar_lea.vmem %s843_s16, 32 }
 0x3a5   :  { %v423_v35 = vpack.c.bf16 %v416_v32, %v415_v31  ;;  %p1049_p8 = scmp.ne.s32.totalorder %s843_s16, %s1048_s17  ;;  %p1053_p9 = scmp.lt.s32.totalorder %s843_s16, %s843_s16 }
 0x3a6   :  { %v422_v36 = vpack.c.bf16 %v414_v34, %v413_v33  ;;  %717 = vperm.xlu1 %1006, %v1139_v5   ;;  %721 = vperm.xlu0 %1005, %v1153_v9   ;;  %v622_v30 = vpop.permute.xlu1 %621  ;;  %v618_v34 = vpop.permute.xlu0 %617  ;;  %p1054_p10 = scmp.lt.s32.totalorder %s1052_s18, %s1048_s17 }
 0x3a8   :  { %944 = vmatprep.subr.bf16.mxu0 %v422_v36  ;;  %p1055_p11 = por %p1054_p10, %p1053_p9 }
 0x3a9   :  { %945 = vmatpush3.bf16.msra.mxu0 %v422_v36 }
 0x3aa   :  { %946 = vmatprep.subr.bf16.mxu0 %v423_v35  ;;  %1007 = vset.pattern.permute.xlu1 %v1085_v26  ;;  %p1056_p12 = pnand %p1055_p11, %p1049_p8 }
 0x3ab   :  { %1008 = vset.pattern.permute.xlu0 %v1085_v26  ;;  %794 = vperm.xlu1 %1007, %v1134_v4   ;;  %v626_v4 = vpop.permute.xlu1 %625 }
 0x3ac   :  { %798 = vperm.xlu0 %1008, %v1147_v8  }
 0x3ad   :  { %947 = vmatpush3.bf16.msra.mxu0 %v423_v35 }
 0x3af   :  { %802 = vperm.xlu1 %1007, %v1139_v5  }
 0x3b0   :  { %949 = vmatmul.mubr.msk.bf16.vlgmr.msra.gmra.mrb[8].mxu0 %vm169_vm2, %v1019_v37  ;;  %1009 = vset.pattern.permute.xlu0 %v1086_v28 }
 0x3b1   :  { %964 = vmatprep.mubr.msk.bf16.mxu0 %vm169_vm2, %v1022_v63  ;;  %830 = vperm.xlu0 %1009, %v827_v27  }
 0x3b3   :  { %806 = vperm.xlu1 %1007, %v1153_v9  }
 0x483   :  { %v950_v42 = vpop.f32.mrb[8].mxu0 }
 0x484   :  { %v490_v43 = vpop.f32.mrb[9].mxu0  ;;  %v499_v46 = vadd.f32 %v950_v42, %v434_v41 }
 0x485   :  { %v491_v47 = vadd.f32 %v490_v43, %v426_v40  ;;  %v951_v48 = vpop.f32.mrb[10].mxu0 }
 0x486   :  { %v502_v49 = vadd.f32 %v951_v48, %v438_v45  ;;  %v493_v50 = vpop.f32.mrb[11].mxu0  ;;  %v1245_v54 = vadd.f32 %v499_v46, %v323_v13  ;;  %v714_v48 = vpop.permute.xlu1 %713 }
 0x487   :  { %v1237_v51 = vadd.f32 %v491_v47, %v321_v10  ;;  %v494_v52 = vadd.f32 %v493_v50, %v430_v44  ;;  %v1025_v47 = vld [vmem:[#allocation2 + $0x68] sm:$0xff]   ;;  %v710_v50 = vpop.permute.xlu0 %709 }
 0x488   :  { %v1241_v53 = vadd.f32 %v502_v49, %v324_v11  ;;  %v511_v59 = vmax.f32 %v1245_v54, 0.0 }
 0x489   :  { %v1249_v55 = vadd.f32 %v494_v52, %v322_v12  ;;  %v509_v56 = vmax.f32 %v1237_v51, 0.0 }
 0x48a   :  { %v512_v57 = vmax.f32 %v1241_v53, 0.0  ;;  %v718_v49 = vpop.permute.xlu1 %717 }
 0x48b   :  { %v510_v58 = vmax.f32 %v1249_v55, 0.0  ;;  %v722_v53 = vpop.permute.xlu0 %721 }
 0x48c   :  { %v519_v61 = vpack.c.bf16 %v512_v57, %v511_v59 }
 0x48d   :  { %v518_v60 = vpack.c.bf16 %v510_v58, %v509_v56 }
 0x48e   :  { %v795_v51 = vpop.permute.xlu1 %794 }
 0x48f   :  { %952 = vmatprep.subr.bf16.mxu1 %v518_v60  ;;  %v799_v0 = vpop.permute.xlu0 %798 }
 0x490   :  { %953 = vmatpush3.bf16.msra.mxu1 %v518_v60 }
 0x491   :  { %954 = vmatprep.subr.bf16.mxu1 %v519_v61 }
 0x494   :  { %955 = vmatpush3.bf16.msra.mxu1 %v519_v61 }
 0x497   :  { %957 = vmatmul.mubr.msk.bf16.vlgmr.msra.gmra.mrb[8].mxu1 %vm169_vm2, %v1021_v62 }
 0x498   :  { %972 = vmatprep.mubr.msk.bf16.mxu1 %vm169_vm2, %v1024_v24  ;;  %v831_v24 = vpop.permute.xlu0 %830 }
 0x56a   :  { %v958_v6 = vpop.f32.mrb[8].mxu1 }
 0x56b   :  { %v595_v10 = vadd.f32 %v958_v6, %v530_v3  ;;  %v586_v11 = vpop.f32.mrb[9].mxu1 }
 0x56c   :  { %v587_v12 = vadd.f32 %v586_v11, %v522_v2  ;;  %v959_v13 = vpop.f32.mrb[10].mxu1 }
 0x56d   :  { %v598_v14 = vadd.f32 %v959_v13, %v534_v7  ;;  %v589_v15 = vpop.f32.mrb[11].mxu1  ;;  %v603_v17 = vmax.f32 %v595_v10, 0.0 }
 0x56e   :  { %v590_v16 = vadd.f32 %v589_v15, %v526_v1  ;;  %v601_v19 = vmax.f32 %v587_v12, 0.0 }
 0x56f   :  { %v604_v18 = vmax.f32 %v598_v14, 0.0 }
 0x570   :  { %v602_v20 = vmax.f32 %v590_v16, 0.0 }
 0x571   :  { %v611_v21 = vpack.c.bf16 %v604_v18, %v603_v17 }
 0x572   :  { %v610_v22 = vpack.c.bf16 %v602_v20, %v601_v19 }
 0x574   :  { %960 = vmatprep.subr.bf16.mxu0 %v610_v22 }
 0x575   :  { %961 = vmatpush3.bf16.msra.mxu0 %v610_v22 }
 0x576   :  { %962 = vmatprep.subr.bf16.mxu0 %v611_v21 }
 0x579   :  { %963 = vmatpush3.bf16.msra.mxu0 %v611_v21 }
 0x57c   :  { %965 = vmatmul.mubr.msk.bf16.vlgmr.msra.gmra.mrb[12].mxu0 %vm169_vm2, %v1023_v23 }
 0x64f   :  { %v966_v31 = vpop.f32.mrb[12].mxu0 }
 0x650   :  { %v687_v32 = vadd.f32 %v966_v31, %v622_v30  ;;  %v678_v33 = vpop.f32.mrb[13].mxu0 }
 0x651   :  { %v679_v35 = vadd.f32 %v678_v33, %v614_v29  ;;  %v967_v8 = vpop.f32.mrb[14].mxu0 }
 0x652   :  { %v695_v36 = vadd.f32 %v687_v32, %v511_v59  ;;  %v690_v37 = vadd.f32 %v967_v8, %v626_v4  ;;  %v681_v38 = vpop.f32.mrb[15].mxu0 }
 0x653   :  { %v693_v5 = vadd.f32 %v679_v35, %v509_v56  ;;  %v682_v39 = vadd.f32 %v681_v38, %v618_v34 }
 0x654   :  { %v696_v9 = vadd.f32 %v690_v37, %v512_v57  ;;  %v699_v41 = vmax.f32 %v695_v36, 0.0 }
 0x655   :  { %v694_v40 = vadd.f32 %v682_v39, %v510_v58  ;;  %v697_v43 = vmax.f32 %v693_v5, 0.0  ;;  %v803_v58 = vpop.permute.xlu1 %802 }
 0x656   :  { %v700_v42 = vmax.f32 %v696_v9, 0.0 }
 0x657   :  { %v698_v44 = vmax.f32 %v694_v40, 0.0 }
 0x658   :  { %v707_v45 = vpack.c.bf16 %v700_v42, %v699_v41 }
 0x659   :  { %v706_v46 = vpack.c.bf16 %v698_v44, %v697_v43  ;;  %v807_v10 = vpop.permute.xlu1 %806 }
 0x65b   :  { %968 = vmatprep.subr.bf16.mxu1 %v706_v46 }
 0x65c   :  { %969 = vmatpush3.bf16.msra.mxu1 %v706_v46 }
 0x65d   :  { %970 = vmatprep.subr.bf16.mxu1 %v707_v45 }
 0x660   :  { %971 = vmatpush3.bf16.msra.mxu1 %v707_v45 }
 0x663   :  { %973 = vmatmul.mubr.msk.bf16.vlgmr.msra.gmra.mrb[12].mxu1 %vm169_vm2, %v1025_v47 }
 0x736   :  { %v974_v52 = vpop.f32.mrb[12].mxu1 }
 0x737   :  { %v783_v54 = vadd.f32 %v974_v52, %v718_v49  ;;  %v774_v55 = vpop.f32.mrb[13].mxu1 }
 0x738   :  { %v775_v56 = vadd.f32 %v774_v55, %v710_v50  ;;  %v975_v57 = vpop.f32.mrb[14].mxu1 }
 0x739   :  { %v786_v59 = vadd.f32 %v975_v57, %v722_v53  ;;  %v777_v60 = vpop.f32.mrb[15].mxu1  ;;  %v791_v61 = vmax.f32 %v783_v54, 0.0 }
 0x73a   :  { %v789_v62 = vmax.f32 %v775_v56, 0.0  ;;  %v778_v63 = vadd.f32 %v777_v60, %v714_v48 }
 0x73b   :  { %v792_v2 = vmax.f32 %v786_v59, 0.0  ;;  %v811_v6 = vmul.f32 %v803_v58, %v791_v61 }
 0x73c   :  { %v809_v1 = vmul.f32 %v795_v51, %v789_v62  ;;  %v790_v3 = vmax.f32 %v778_v63, 0.0 }
 0x73d   :  { %v812_v11 = vmul.f32 %v807_v10, %v792_v2  ;;  %v817_v15 = vsel %vm813_vm3, %v811_v6, 0.0 }
 0x73e   :  { %v810_v7 = vmul.f32 %v799_v0, %v790_v3  ;;  %v814_v12 = vsel %vm813_vm3, %v809_v1, 0.0 }
 0x73f   :  { %v819_v17 = vsel %vm813_vm3, %v812_v11, 0.0 }
 0x740   :  { %v815_v13 = vsel %vm813_vm3, %v810_v7, 0.0 }
 0x741   :  { %v816_v14 = vadd.f32 %v815_v13, %v814_v12 }
 0x743   :  { %v818_v16 = vadd.f32 %v817_v15, %v816_v14 }
 0x745   :  { %v820_v18 = vadd.f32 %v819_v17, %v818_v16 }
 0x747   :  { %v821_v19 = vrot.slane %v820_v18, 4 }
 0x749   :  { %v822_v20 = vadd.f32 %v821_v19, %v820_v18 }
 0x74b   :  { %v823_v21 = vrot.slane %v822_v20, 2 }
 0x74d   :  { %v824_v22 = vadd.f32 %v823_v21, %v822_v20 }
 0x74f   :  { %v825_v23 = vrot.slane %v824_v22, 1 }
 0x751   :  { %v826_v25 = vadd.f32 %v825_v23, %v824_v22 }
 0x753   :  { %v833_v26 = vadd.f32 %v831_v24, %v826_v25 }
 0x755   :  { %835 = vst.msk [vmem:[#allocation5] sm:$0x1] %vm834_vm4, %v833_v26 }
 0x756   :  { %1059 = shalt.err (!%p1056_p12)
}
 0x757   :  { %s1060_s21 = scalar_lea.hbm %s1307_s4, 16 }
 0x758   :  { %p1061_p13 = scmp.ne.s32.totalorder %s1307_s4, %s1060_s21  ;;  %p1064_p0 = scmp.lt.u32.totalorder %s1060_s21, %s1307_s4 }
 0x75a   :  { %p1066_p1 = pnand %p1064_p0, %p1061_p13 }
 0x75c   :  { %1069 = shalt.err (!%p1066_p1)
}
 0x75d   :  { %845 = dma.vmem_to_hbm [thread:$0]  %s843_s16, 16, %s1307_s4, [#allocation4]  }
 0x75e   :  { %1072 = dma.done.wait [#allocation4], 16  }
 0x75f   :  { %1073 = vsyncadd [#allocation4], 4294967280 }
 0x760   :  { %849 = vsyncpa [#allocation3], 1 }
 0x761   :  { %850 = vsyncpa [#allocation4], 1 }

</bundles_post_ra>
